<compile_context>
chip_gen: v7x
topology: tpu7x:2x2x1
jax: 0.10.0
libtpu: 0.0.40
codegen_flags: <defaults>
</compile_context>

<pallas_src>
import jax
import jax.numpy as jnp
from jax.experimental import pallas as pl
from jax.experimental.pallas import tpu as pltpu

NUM_NEURONS = 128
MAX_BLOCK_B = 4096  # rows per tile cap (fits v5e 16 MiB scoped VMEM w/ limit raised)


def qnet_kernel(x_ref, w1_ref, b1_ref, w2_ref, b2_ref, w3_ref, b3_ref, o_ref):
    cdt = w1_ref.dtype                      # matmul operand dtype (bf16 or f32)

    # fc1: single MXU pass over the packed (state || action) block.
    h1 = (jnp.dot(x_ref[...], w1_ref[...], preferred_element_type=jnp.float32)
          + b1_ref[...])
    h1 = jnp.maximum(h1, 0.0)

    # fc2
    h2 = (jnp.dot(h1.astype(cdt), w2_ref[...], preferred_element_type=jnp.float32)
          + b2_ref[...])
    h2 = jnp.maximum(h2, 0.0)

    # fc3 head (out_features == 1): VPU multiply + XLU lane reduction instead
    # of a 128x1 MXU matmul; scalar bias comes from SMEM.
    q = jnp.sum(h2 * w3_ref[...], axis=-1, keepdims=True) + b3_ref[0, 0]
    o_ref[...] = q.astype(o_ref.dtype)


def _round_up(x, m):
    return ((x + m - 1) // m) * m


def qnet_forward(state, action, params, *, block_b=None,
                 matmul_dtype=jnp.bfloat16):
    """state: (B, state_dim), action: (B, action_dim) -> (B, 1) float32."""
    w1, b1, w2, b2, w3, b3 = params
    B, sd = state.shape
    ad = action.shape[1]
    K = sd + ad

    # Pack (state || action) once in the wrapper and cast the matmul operands
    # here; biases and the fc3 head row stay f32.
    x = jnp.concatenate([state.astype(jnp.float32),
                         action.astype(jnp.float32)], axis=1)
    x = x.astype(matmul_dtype)
    w1c = w1.astype(matmul_dtype)
    w2c = w2.astype(matmul_dtype)
    w3r = jnp.reshape(w3, (1, NUM_NEURONS)).astype(jnp.float32)
    b1r = jnp.reshape(b1, (1, NUM_NEURONS)).astype(jnp.float32)
    b2r = jnp.reshape(b2, (1, NUM_NEURONS)).astype(jnp.float32)
    b3r = jnp.reshape(b3, (1, 1)).astype(jnp.float32)

    # Batch tiling:
    #  - B <= 256: single tile (launch-overhead regime; block == full array so
    #    no (8,128) divisibility concern).
    #  - B  > 256: balanced tiles, >= 2 grid steps (v7x megacore), rounded up
    #    to a multiple of 8 rows, capped at MAX_BLOCK_B.
    if block_b is None:
        if B <= 256:
            block_b = B
        else:
            n_tiles = max(2, pl.cdiv(B, MAX_BLOCK_B))
            block_b = _round_up(pl.cdiv(B, n_tiles), 8)
    block_b = min(block_b, _round_up(B, 8))

    b_pad = pl.cdiv(B, block_b) * block_b
    if b_pad != B:
        x = jnp.pad(x, ((0, b_pad - B), (0, 0)))
    grid = (b_pad // block_b,)

    def resident(shape):
        # Constant block index -> fetched once, stays resident across the grid.
        # (pl.Buffered(1) single-buffering left out; second buffer is ~70 KB.)
        return pl.BlockSpec(shape, lambda i: (0, 0))

    out = pl.pallas_call(
        qnet_kernel,
        out_shape=jax.ShapeDtypeStruct((b_pad, 1), jnp.float32),
        grid=grid,
        in_specs=[
            pl.BlockSpec((block_b, K), lambda i: (i, 0)),        # packed input rows
            resident(w1c.shape), resident(b1r.shape),
            resident(w2c.shape), resident(b2r.shape),
            resident(w3r.shape),
            pl.BlockSpec(memory_space=pltpu.MemorySpace.SMEM),   # scalar fc3 bias
        ],
        out_specs=pl.BlockSpec((block_b, 1), lambda i: (i, 0)),
        compiler_params=pltpu.CompilerParams(
            dimension_semantics=("parallel",),
            vmem_limit_bytes=32 * 1024 * 1024),
    )(x, w1c, b1r, w2c, b2r, w3r, b3r)
    return out[:B]


def init_params(key, state_dim, action_dim):
    """PyTorch-style uniform(-1/sqrt(fan_in), 1/sqrt(fan_in)) init, (in,out) layout."""
    in_dim = state_dim + action_dim
    dims = [(in_dim, NUM_NEURONS), (NUM_NEURONS, NUM_NEURONS), (NUM_NEURONS, 1)]
    params = []
    for fan_in, fan_out in dims:
        key, kw, kb = jax.random.split(key, 3)
        bound = 1.0 / jnp.sqrt(fan_in)
        w = jax.random.uniform(kw, (fan_in, fan_out), jnp.float32, -bound, bound)
        b = jax.random.uniform(kb, (1, fan_out), jnp.float32, -bound, bound)
        params += [w, b]
    return tuple(params)


def qnet_reference(state, action, params):
    x = jnp.concatenate([state, action], axis=1).astype(jnp.float32)
    w1, b1, w2, b2, w3, b3 = params
    h1 = jax.nn.relu(x @ w1 + b1)
    h2 = jax.nn.relu(h1 @ w2 + b2)
    return h2 @ w3 + b3


if __name__ == "__main__":
    key = jax.random.PRNGKey(0)
    batch, state_dim, action_dim = 8, 8, 4

    k_s, k_a, k_p, k_s2, k_a2 = jax.random.split(key, 5)
    state = jax.random.normal(k_s, (batch, state_dim), jnp.float32)
    action = jax.random.normal(k_a, (batch, action_dim), jnp.float32)
    params = init_params(k_p, state_dim, action_dim)
    q_ref = qnet_reference(state, action, params)

    # Exact-precision path (f32 matmul operands) vs the JAX reference.
    q_f32 = qnet_forward(state, action, params, matmul_dtype=jnp.float32)
    jax.block_until_ready(q_f32)
    assert q_f32.shape == (batch, 1)
    assert jnp.allclose(q_f32, q_ref, atol=1e-4, rtol=1e-4), "f32 path mismatch"

    # Default fast path: bf16 matmul operands, f32 accumulation.
    q_bf16 = qnet_forward(state, action, params)
    jax.block_until_ready(q_bf16)
    assert jnp.allclose(q_bf16, q_ref, atol=5e-2, rtol=5e-2), "bf16 path mismatch"

    # Tiled + padded path: balanced tiles (B=2500 -> 2 tiles of 1256 rows).
    big_b = 2500
    state_b = jax.random.normal(k_s2, (big_b, state_dim), jnp.float32)
    action_b = jax.random.normal(k_a2, (big_b, action_dim), jnp.float32)
    q_big = qnet_forward(state_b, action_b, params)
    jax.block_until_ready(q_big)
    q_big_ref = qnet_reference(state_b, action_b, params)
    assert q_big.shape == (big_b, 1)
    assert jnp.allclose(q_big, q_big_ref, atol=5e-2, rtol=5e-2), "tiled path mismatch"

    print("KERNEL_OK")
</pallas_src>

<mosaic_0001>
module attributes {stable_mosaic.version = 11 : i64} {
  func.func @qnet_kernel(%arg0: i32, %arg1: memref<8x12xf32, #tpu.memory_space<vmem>>, %arg2: memref<12x128xf32, #tpu.memory_space<vmem>>, %arg3: memref<1x128xf32, #tpu.memory_space<vmem>>, %arg4: memref<128x128xf32, #tpu.memory_space<vmem>>, %arg5: memref<1x128xf32, #tpu.memory_space<vmem>>, %arg6: memref<1x128xf32, #tpu.memory_space<vmem>>, %arg7: memref<1x1xf32, #tpu.memory_space<smem>>, %arg8: memref<8x1xf32, #tpu.memory_space<vmem>>) attributes {dimension_semantics = [#tpu.dimension_semantics<parallel>], iteration_bounds = array<i64: 1>, scalar_prefetch = 0 : i64, scratch_operands = 0 : i64, tpu.core_type = #tpu.core_type<tc>, window_params = [{transform_indices = @transform_0, window_bounds = array<i64: 8, 12>}, {pipeline_mode = #tpu.pipeline_mode<synchronous>, transform_indices = @transform_1, window_bounds = array<i64: 12, 128>}, {pipeline_mode = #tpu.pipeline_mode<synchronous>, transform_indices = @transform_2, window_bounds = array<i64: 1, 128>}, {pipeline_mode = #tpu.pipeline_mode<synchronous>, transform_indices = @transform_3, window_bounds = array<i64: 128, 128>}, {pipeline_mode = #tpu.pipeline_mode<synchronous>, transform_indices = @transform_4, window_bounds = array<i64: 1, 128>}, {pipeline_mode = #tpu.pipeline_mode<synchronous>, transform_indices = @transform_5, window_bounds = array<i64: 1, 128>}, {transform_indices = @transform_6, window_bounds = array<i64: 1, 1>}, {transform_indices = @transform_7, window_bounds = array<i64: 8, 1>}]} {
    %c0 = arith.constant 0 : index
    %c0_0 = arith.constant 0 : index
    %0 = vector.load %arg1[%c0, %c0_0] : memref<8x12xf32, #tpu.memory_space<vmem>>, vector<8x12xf32>
    %c0_1 = arith.constant 0 : index
    %c0_2 = arith.constant 0 : index
    %1 = vector.load %arg2[%c0_1, %c0_2] : memref<12x128xf32, #tpu.memory_space<vmem>>, vector<12x128xf32>
    %cst = arith.constant dense<0.000000e+00> : vector<8x128xf32>
    %2 = tpu.matmul %0, %1, %cst {dimension_numbers = #tpu.dot_dimension_numbers<[1], [0], [0], [1], [0, 0, 1, 1], [], []>} : vector<8x12xf32>, vector<12x128xf32>, vector<8x128xf32> -> vector<8x128xf32>
    %c0_3 = arith.constant 0 : index
    %c0_4 = arith.constant 0 : index
    %3 = vector.load %arg3[%c0_3, %c0_4] : memref<1x128xf32, #tpu.memory_space<vmem>>, vector<1x128xf32>
    %4 = vector.broadcast %3 : vector<1x128xf32> to vector<8x128xf32>
    %5 = arith.addf %2, %4 : vector<8x128xf32>
    %cst_5 = arith.constant 0.000000e+00 : f32
    %6 = vector.broadcast %cst_5 : f32 to vector<8x128xf32>
    %7 = arith.maximumf %5, %6 : vector<8x128xf32>
    %c0_6 = arith.constant 0 : index
    %c0_7 = arith.constant 0 : index
    %8 = vector.load %arg4[%c0_6, %c0_7] : memref<128x128xf32, #tpu.memory_space<vmem>>, vector<128x128xf32>
    %cst_8 = arith.constant dense<0.000000e+00> : vector<8x128xf32>
    %9 = tpu.matmul %7, %8, %cst_8 {dimension_numbers = #tpu.dot_dimension_numbers<[1], [0], [0], [1], [0, 0, 1, 1], [], []>} : vector<8x128xf32>, vector<128x128xf32>, vector<8x128xf32> -> vector<8x128xf32>
    %c0_9 = arith.constant 0 : index
    %c0_10 = arith.constant 0 : index
    %10 = vector.load %arg5[%c0_9, %c0_10] : memref<1x128xf32, #tpu.memory_space<vmem>>, vector<1x128xf32>
    %11 = vector.broadcast %10 : vector<1x128xf32> to vector<8x128xf32>
    %12 = arith.addf %9, %11 : vector<8x128xf32>
    %cst_11 = arith.constant 0.000000e+00 : f32
    %13 = vector.broadcast %cst_11 : f32 to vector<8x128xf32>
    %14 = arith.maximumf %12, %13 : vector<8x128xf32>
    %c0_12 = arith.constant 0 : index
    %c0_13 = arith.constant 0 : index
    %15 = vector.load %arg6[%c0_12, %c0_13] : memref<1x128xf32, #tpu.memory_space<vmem>>, vector<1x128xf32>
    %16 = vector.broadcast %15 : vector<1x128xf32> to vector<8x128xf32>
    %17 = arith.mulf %14, %16 : vector<8x128xf32>
    %cst_14 = arith.constant dense<0.000000e+00> : vector<8xf32>
    %18 = vector.multi_reduction <add>, %17, %cst_14 [1] : vector<8x128xf32> to vector<8xf32>
    %19 = vector.shape_cast %18 : vector<8xf32> to vector<8x1xf32>
    %c0_15 = arith.constant 0 : index
    %c0_16 = arith.constant 0 : index
    %20 = memref.load %arg7[%c0_15, %c0_16] : memref<1x1xf32, #tpu.memory_space<smem>>
    %21 = vector.broadcast %20 : f32 to vector<8x1xf32>
    %22 = arith.addf %19, %21 : vector<8x1xf32>
    %c0_17 = arith.constant 0 : index
    %c0_18 = arith.constant 0 : index
    %23 = vector.load %arg8[%c0_17, %c0_18] : memref<8x1xf32, #tpu.memory_space<vmem>>, vector<8x1xf32>
    tpu.vector_store %arg8[%c0_17, %c0_18], %22 {strides = array<i32>} : memref<8x1xf32, #tpu.memory_space<vmem>>, vector<8x1xf32>,
    return
  }
  func.func @transform_0(%arg0: i32) -> (i32, i32) {
    %c0_i32 = arith.constant 0 : i32
    %c0_i32_0 = arith.constant 0 : i32
    return %arg0, %c0_i32 : i32, i32
  }
  func.func @transform_1(%arg0: i32) -> (i32, i32) {
    %c0_i32 = arith.constant 0 : i32
    %c0_i32_0 = arith.constant 0 : i32
    %c0_i32_1 = arith.constant 0 : i32
    return %c0_i32, %c0_i32_0 : i32, i32
  }
  func.func @transform_2(%arg0: i32) -> (i32, i32) {
    %c0_i32 = arith.constant 0 : i32
    %c0_i32_0 = arith.constant 0 : i32
    %c0_i32_1 = arith.constant 0 : i32
    return %c0_i32, %c0_i32_0 : i32, i32
  }
  func.func @transform_3(%arg0: i32) -> (i32, i32) {
    %c0_i32 = arith.constant 0 : i32
    %c0_i32_0 = arith.constant 0 : i32
    %c0_i32_1 = arith.constant 0 : i32
    return %c0_i32, %c0_i32_0 : i32, i32
  }
  func.func @transform_4(%arg0: i32) -> (i32, i32) {
    %c0_i32 = arith.constant 0 : i32
    %c0_i32_0 = arith.constant 0 : i32
    %c0_i32_1 = arith.constant 0 : i32
    return %c0_i32, %c0_i32_0 : i32, i32
  }
  func.func @transform_5(%arg0: i32) -> (i32, i32) {
    %c0_i32 = arith.constant 0 : i32
    %c0_i32_0 = arith.constant 0 : i32
    %c0_i32_1 = arith.constant 0 : i32
    return %c0_i32, %c0_i32_0 : i32, i32
  }
  func.func @transform_6(%arg0: i32) -> (i32, i32) {
    %c0_i32 = arith.constant 0 : i32
    %c0_i32_0 = arith.constant 0 : i32
    %c0_i32_1 = arith.constant 0 : i32
    return %c0_i32, %c0_i32_0 : i32, i32
  }
  func.func @transform_7(%arg0: i32) -> (i32, i32) {
    %c0_i32 = arith.constant 0 : i32
    %c0_i32_0 = arith.constant 0 : i32
    return %arg0, %c0_i32 : i32, i32
  }
}

</mosaic_0001>

<bundles_post_ra>
// kernel: tpu_custom_call.1
= control target key start
LH: loop header
LB: loop body
LE: loop exit
PB: predicated region body
PF: predicated region fallthrough
CT: control target
= control target key end

     0   :  { %13 = vsyncpa [#allocation4], 0  ;;  %s550_s0 = inlined_call_operand.hbm [shape: f32[8,12], index: 0, kind: input, shape index: {}]   ;;  %s551_s1 = inlined_call_operand.hbm [shape: f32[12,128], index: 1, kind: input, shape index: {}]   ;;  %s552_s2 = inlined_call_operand.vmem [shape: f32[1,128], index: 2, kind: input, shape index: {}]   ;;  %s553_s3 = inlined_call_operand.hbm [shape: f32[128,128], index: 3, kind: input, shape index: {}]   ;;  %s554_s4 = inlined_call_operand.vmem [shape: f32[1,128], index: 4, kind: input, shape index: {}]   ;;  %s555_s5 = inlined_call_operand.vmem [shape: f32[1,128], index: 5, kind: input, shape index: {}]   ;;  %s556_s6 = inlined_call_operand.<no memory space> [shape: f32[1,1], index: 6, kind: input, shape index: {}]   ;;  %s557_s7 = inlined_call_operand.vmem [shape: f32[8,1], index: 7, kind: output, shape index: {}]  }
   0x1   :  { %14 = vsyncpa [#allocation6], 0  ;;  %s444_s24 = smov [#allocation5]   ;;  %s374_s28 = scalar_lea.hbm %s551_s1, 256 }
   0x2   :  { %s30_s25 = sshll.u32 %s444_s24, 4  ;;  %p375_p0 = scmp.ne.s32.totalorder %s551_s1, %s374_s28  ;;  %s31_s25 = int_to_ptr.vmem [resolvable:$true] %s30_s25 }
   0x3   :  { %p378_p1 = scmp.lt.u32.totalorder %s374_s28, %s551_s1 }
   0x5   :  { %p380_p2 = pnand %p378_p1, %p375_p0 }
   0x7   :  { %383 = shalt.err (!%p380_p2)
}
   0x8   :  { %s384_s10 = scalar_lea.vmem %s31_s25, 256  ;;  %p389_p4 = scmp.lt.s32.totalorder %s31_s25, %s31_s25 }
   0x9   :  { %p385_p3 = scmp.ne.s32.totalorder %s31_s25, %s384_s10  ;;  %p390_p5 = scmp.lt.s32.totalorder %s384_s10, %s384_s10 }
   0xb   :  { %p391_p6 = por %p390_p5, %p389_p4 }
   0xd   :  { %p392_p7 = pnand %p391_p6, %p385_p3 }
   0xf   :  { %395 = shalt.err (!%p392_p7)
}
  0x10   :  { %s445_s11 = smov 128   ;;  %s446_s12 = smov 8  }
  0x11   :  { %36 = dma.hbm_to_vmem [thread:$0]  %s551_s1, 256, %s31_s25, [#allocation6], %s445_s11, %s445_s11, %s446_s12  }
  0x12   :  { %s447_s15 = smov [#allocation3]   ;;  %s448_s17 = smov [#allocation7]  }
  0x13   :  { %s21_s16 = sshll.u32 %s447_s15, 4  ;;  %s44_s18 = sshll.u32 %s448_s17, 4  ;;  %s22_s16 = int_to_ptr.vmem [resolvable:$true] %s21_s16  ;;  %s45_s18 = int_to_ptr.vmem [resolvable:$true] %s44_s18 }
  0x14   :  { %s396_s21 = scalar_lea.hbm %s550_s0, 128 }
  0x15   :  { %p397_p8 = scmp.ne.s32.totalorder %s550_s0, %s396_s21  ;;  %p400_p9 = scmp.lt.u32.totalorder %s396_s21, %s550_s0 }
  0x17   :  { %p402_p10 = pnand %p400_p9, %p397_p8 }
  0x19   :  { %405 = shalt.err (!%p402_p10)
}
  0x1a   :  { %s406_s1 = scalar_lea.vmem %s22_s16, 128  ;;  %p411_p12 = scmp.lt.s32.totalorder %s22_s16, %s22_s16 }
  0x1b   :  { %p407_p11 = scmp.ne.s32.totalorder %s22_s16, %s406_s1  ;;  %p412_p13 = scmp.lt.s32.totalorder %s406_s1, %s406_s1 }
  0x1d   :  { %p413_p0 = por %p412_p13, %p411_p12 }
  0x1f   :  { %p414_p1 = pnand %p413_p0, %p407_p11 }
  0x21   :  { %417 = shalt.err (!%p414_p1)
}
  0x22   :  { %24 = dma.hbm_to_vmem [thread:$0]  %s550_s0, 128, %s22_s16, [#allocation4]  }
  0x23   :  { %s418_s30 = scalar_lea.hbm %s553_s3, 2048 }
  0x24   :  { %p419_p2 = scmp.ne.s32.totalorder %s553_s3, %s418_s30  ;;  %p422_p3 = scmp.lt.u32.totalorder %s418_s30, %s553_s3 }
  0x26   :  { %p424_p4 = pnand %p422_p3, %p419_p2 }
  0x28   :  { %427 = shalt.err (!%p424_p4)
}
  0x29   :  { %s428_s14 = scalar_lea.vmem %s45_s18, 2048  ;;  %p433_p6 = scmp.lt.s32.totalorder %s45_s18, %s45_s18 }
  0x2a   :  { %p429_p5 = scmp.ne.s32.totalorder %s45_s18, %s428_s14  ;;  %p434_p7 = scmp.lt.s32.totalorder %s428_s14, %s428_s14 }
  0x2c   :  { %p435_p8 = por %p434_p7, %p433_p6 }
  0x2e   :  { %p436_p9 = pnand %p435_p8, %p429_p5 }
  0x30   :  { %439 = shalt.err (!%p436_p9)
}
  0x31   :  { %50 = dma.hbm_to_vmem [thread:$0]  %s553_s3, 2048, %s45_s18, [#allocation6], %s445_s11, %s445_s11, %s446_s12  }
  0x32   :  { %440 = dma.done.wait [#allocation4], 128  }
  0x33   :  { %441 = vsyncadd [#allocation4], 4294967168 }
  0x34   :  { %442 = dma.done.wait [#allocation6], 2304  }
  0x35   :  { %443 = vsyncadd [#allocation6], 4294964992  ;;  %v449_v0 = vmov 0.0|0.0   ;;  %vm450_vm0 = vmmov 0   ;;  %v451_v1 = vmov 0.0   ;;  %vm80_vm1 = vcmask 1043456  }
  0x36   :  { %337 = vmatprep.subr.bf16.mxu0 %v449_v0  ;;  %341 = vmatprep.subr.bf16.mxu1 %v449_v0  ;;  %v67_v2 = vld [vmem:[#allocation5] sm:$0xff]  ;;  %v68_v3 = vld [vmem:[#allocation5 + $0x8] sm:$0xf]  ;;  %vm452_vm2 = vmmov 1   ;;  %v155_v5 = vld [vmem:[#allocation7] sm:$0xff]  ;;  %vm76_vm4 = vcmask 97280   ;;  %v260_v42 = vstv %s556_s6 }
  0x37   :  { %299 = vmatprep.mubr.msk.f32.mxu0 %vm450_vm0, %v451_v1  ;;  %334 = vmatprep.mubr.msk.f32.mxu1 %vm450_vm0, %v451_v1  ;;  %vm339_vm3 = vmpackc.low %vm80_vm1, %vm452_vm2  ;;  %v338_v4 = vpack.c.bf16 %v68_v3, %v67_v2  ;;  %v156_v6 = vld [vmem:[#allocation7 + $0x8] sm:$0xff]  ;;  %v157_v7 = vld [vmem:[#allocation7 + $0x10] sm:$0xff]  ;;  %vm262_vm5 = vcmask 7168  }
  0x38   :  { %v342_v8 = vpack.c.bf16 %v156_v6, %v155_v5  ;;  %v158_v9 = vld [vmem:[#allocation7 + $0x18] sm:$0xff]  ;;  %v66_v10 = vld [vmem:[#allocation3] sm:$0xff]  ;;  %v159_v12 = vld [vmem:[#allocation7 + $0x20] sm:$0xff] }
  0x39   :  { %340 = vmatpush3.bf16.msk.msra.mxu0 %vm339_vm3, %v338_v4  ;;  %v345_v11 = vpack.c.bf16 %v158_v9, %v157_v7  ;;  %v160_v13 = vld [vmem:[#allocation7 + $0x28] sm:$0xff]  ;;  %v161_v15 = vld [vmem:[#allocation7 + $0x30] sm:$0xff]  ;;  %v162_v16 = vld [vmem:[#allocation7 + $0x38] sm:$0xff] }
  0x3a   :  { %343 = vmatpush3.bf16.msra.mxu1 %v342_v8  ;;  %v348_v14 = vpack.c.bf16 %v160_v13, %v159_v12  ;;  %v351_v17 = vpack.c.bf16 %v162_v16, %v161_v15  ;;  %v163_v18 = vld [vmem:[#allocation7 + $0x40] sm:$0xff]  ;;  %v164_v19 = vld [vmem:[#allocation7 + $0x48] sm:$0xff]  ;;  %v165_v21 = vld [vmem:[#allocation7 + $0x50] sm:$0xff] }
  0x3b   :  { %344 = vmatprep.subr.bf16.mxu1 %v449_v0  ;;  %v354_v20 = vpack.c.bf16 %v164_v19, %v163_v18  ;;  %v166_v22 = vld [vmem:[#allocation7 + $0x58] sm:$0xff]  ;;  %v167_v24 = vld [vmem:[#allocation7 + $0x60] sm:$0xff]  ;;  %v168_v25 = vld [vmem:[#allocation7 + $0x68] sm:$0xff] }
  0x3c   :  { %300 = vmatmul.mubr.msk.f32.vlgmr.msra.gmra.mrb[0].mxu0 %vm76_vm4, %v66_v10  ;;  %v357_v23 = vpack.c.bf16 %v166_v22, %v165_v21  ;;  %v360_v26 = vpack.c.bf16 %v168_v25, %v167_v24  ;;  %v169_v27 = vld [vmem:[#allocation7 + $0x70] sm:$0xff]  ;;  %v170_v28 = vld [vmem:[#allocation7 + $0x78] sm:$0xff]  ;;  %v270_v30 = vld [vmem:[%s552_s2] ss:$0 sm:$0xff] }
  0x3d   :  { %v363_v29 = vpack.c.bf16 %v170_v28, %v169_v27  ;;  %v273_v35 = vld [vmem:[%s554_s4] ss:$0 sm:$0xff] }
  0x3e   :  { %346 = vmatpush3.bf16.msra.mxu1 %v345_v11  ;;  %v274_v39 = vld [vmem:[%s555_s5] ss:$0 sm:$0xff] }
  0x3f   :  { %347 = vmatprep.subr.bf16.mxu1 %v449_v0 }
  0x42   :  { %349 = vmatpush3.bf16.msra.mxu1 %v348_v14 }
  0x43   :  { %350 = vmatprep.subr.bf16.mxu1 %v449_v0 }
  0x46   :  { %352 = vmatpush3.bf16.msra.mxu1 %v351_v17 }
  0x47   :  { %353 = vmatprep.subr.bf16.mxu1 %v449_v0 }
  0x4a   :  { %355 = vmatpush3.bf16.msra.mxu1 %v354_v20 }
  0x4b   :  { %356 = vmatprep.subr.bf16.mxu1 %v449_v0 }
  0x4e   :  { %358 = vmatpush3.bf16.msra.mxu1 %v357_v23 }
  0x4f   :  { %359 = vmatprep.subr.bf16.mxu1 %v449_v0 }
  0x52   :  { %361 = vmatpush3.bf16.msra.mxu1 %v360_v26 }
  0x53   :  { %362 = vmatprep.subr.bf16.mxu1 %v449_v0 }
  0x56   :  { %364 = vmatpush3.bf16.msra.mxu1 %v363_v29 }
 0x10f   :  { %v150_v31 = vpop.f32.mrb[0].mxu0 }
 0x110   :  { %v151_v32 = vadd.f32 %v270_v30, %v150_v31  ;;  %v301_v33 = vpop.f32.mrb[1].mxu0 }
 0x112   :  { %v154_v34 = vmax.f32 %v151_v32, 0.0 }
 0x114   :  { %335 = vmatmul.mubr.f32.vlgmr.msra.gmra.mrb[0].mxu1 %v154_v34 }
 0x1e7   :  { %v244_v36 = vpop.f32.mrb[0].mxu1 }
 0x1e8   :  { %v245_v37 = vadd.f32 %v273_v35, %v244_v36  ;;  %v336_v38 = vpop.f32.mrb[1].mxu1 }
 0x1ea   :  { %v248_v40 = vmax.f32 %v245_v37, 0.0 }
 0x1ec   :  { %v256_v41 = vmul.f32 %v274_v39, %v248_v40 }
 0x1ee   :  { %257 = vadd.xlane.f32.xlu0 %v256_v41 }
 0x27b   :  { %v258_v43 = vpop.xlane.xlu0 %257 }
 0x27c   :  { %v261_v44 = vadd.f32 %v260_v42, %v258_v43 }
 0x27e   :  { %263 = vst.msk [vmem:[%s557_s7] sm:$0xff] %vm262_vm5, %v261_v44 }
 0x27f   :  { %268 = vsyncpa [#allocation4], 1 }
 0x280   :  { %269 = vsyncpa [#allocation6], 1 }

</bundles_post_ra>
